<compile_context>
chip_gen: v6e
topology: v6e:2x2x1
jax: 0.10.0
libtpu: 0.0.40
codegen_flags: <defaults>
</compile_context>

<pallas_src>
import jax
import jax.numpy as jnp
from jax import lax
from jax.experimental import pallas as pl
from jax.experimental.pallas import tpu as pltpu


def _round_up(x: int, m: int) -> int:
    return (x + m - 1) // m * m


def _make_cfd_kernel(b1: int, b2: int, b1p: int, b2p: int,
                     t_total: int, t_tile: int):
    inv_b1 = 1.0 / float(b1)
    inv_b2 = 1.0 / float(b2)
    pad1 = float(b1p - b1)          # zero-padded target rows
    pad2 = float(b2p - b2)          # zero-padded synthetic rows

    def cfd_kernel(ab_ref, t_ref, fcat_ref, out_ref):
        # s[b, f] = <feat_cat[b, :], t[f, :]>  (t pre-transposed to [D, t_tile],
        # so frequencies land on the lane axis and no RHS transpose is needed).
        s = lax.dot_general(
            fcat_ref[...], t_ref[...],
            (((1,), (0,)), ((), ())),
            preferred_element_type=jnp.float32)        # [Bcp, t_tile]

        cos_s = jnp.cos(s)                              # VPU-bound part
        sin_s = jnp.sin(s)

        # Batch split at a sublane boundary (b2p % 8 == 0): synthetic rows
        # first, target rows after.  Padded rows are exact zero vectors, so
        # they contribute cos(0)=1 / sin(0)=0 per frequency; subtract the pad
        # count to undo that (exact).
        x_real = (jnp.sum(cos_s[:b2p], axis=0, keepdims=True) - pad2) * inv_b2
        x_imag = jnp.sum(sin_s[:b2p], axis=0, keepdims=True) * inv_b2
        tg_real = (jnp.sum(cos_s[b2p:], axis=0, keepdims=True) - pad1) * inv_b1
        tg_imag = jnp.sum(sin_s[b2p:], axis=0, keepdims=True) * inv_b1

        x_norm = jnp.sqrt(x_real * x_real + x_imag * x_imag)      # [1, t_tile]
        tg_norm = jnp.sqrt(tg_real * tg_real + tg_imag * tg_imag)

        amp_diff = tg_norm - x_norm
        loss_amp = amp_diff * amp_diff
        loss_pha = 2.0 * (tg_norm * x_norm
                          - x_real * tg_real
                          - x_imag * tg_imag)
        loss_pha = jnp.maximum(loss_pha, 1e-12)

        alpha = ab_ref[0]                               # runtime scalars (SMEM)
        beta = ab_ref[1]
        per_freq = jnp.sqrt(alpha * loss_amp + beta * loss_pha)   # [1, t_tile]

        # t was zero-padded to a whole number of tiles, so padded frequencies
        # hold finite but bogus values; mask them out.  Keep this as a SELECT
        # (jnp.where), not a multiply, so nothing non-finite could ever leak.
        col = lax.broadcasted_iota(jnp.int32, (1, t_tile), 1)
        gcol = pl.program_id(0) * t_tile + col
        per_freq = jnp.where(gcol < t_total, per_freq, 0.0)

        tile_sum = jnp.sum(per_freq)
        # One aligned (8,128) block per tile (unmasked store); wrapper reduces.
        out_ref[...] = jnp.broadcast_to(tile_sum, (8, 128)).astype(jnp.float32)

    return cfd_kernel


def _choose_t_tiling(t_total: int, bcp: int):
    """Pick (t_tile, padded_T).

    * Keep each of s / cos_s / sin_s around <=16 vregs (16K f32) so nothing
      spills, but take the largest tile under that budget to amortize the
      ~0.35us per-grid-step overhead.
    * Aim for >=2 tiles (each a multiple of 128 lanes) so the "parallel"
      frequency axis actually splits across v7x's two TensorCores; on
      v5e/v6e the one extra grid step is noise.
    """
    lane_budget = max(128, (16 * 1024 // max(bcp, 8)) // 128 * 128)
    cap = min(2048, lane_budget)
    if t_total <= 128:
        return t_total, t_total                      # single full-extent tile
    t_tile = min(cap, _round_up(pl.cdiv(t_total, 2), 128))
    t_tile = max(t_tile, 128)
    t_pad = _round_up(t_total, t_tile)
    return t_tile, t_pad


def _cf_loss_impl(ab, feat_tg, feat, t):
    T, D = t.shape
    B1 = feat_tg.shape[0]
    B2 = feat.shape[0]
    B1p = _round_up(B1, 8)
    B2p = _round_up(B2, 8)
    Bcp = B1p + B2p

    # One fused MXU operand: synthetic rows first, target rows after, each
    # group zero-padded to a sublane multiple so the kernel can slice.
    feat_p = jnp.pad(feat, ((0, B2p - B2), (0, 0)))
    feat_tg_p = jnp.pad(feat_tg, ((0, B1p - B1), (0, 0)))
    feat_cat = jnp.concatenate([feat_p, feat_tg_p], axis=0)         # [Bcp, D]

    t_tile, T_pad = _choose_t_tiling(T, Bcp)
    num_tiles = T_pad // t_tile

    # Pre-transpose t (frequencies on lanes) and zero-pad to a whole number of
    # tiles so every block read is in bounds and tiles are lane-dense.
    t_T = jnp.pad(t, ((0, T_pad - T), (0, 0))).T                     # [D, T_pad]

    kernel = _make_cfd_kernel(B1, B2, B1p, B2p, T, t_tile)

    cost = pl.CostEstimate(
        flops=2 * T_pad * Bcp * D,
        transcendentals=2 * T_pad * Bcp,               # sin + cos dominate
        bytes_accessed=4 * (D * T_pad + Bcp * D + num_tiles * 8 * 128 + 2))

    partials = pl.pallas_call(
        kernel,
        out_shape=jax.ShapeDtypeStruct((num_tiles * 8, 128), jnp.float32),
        grid=(num_tiles,),
        in_specs=[
            pl.BlockSpec(memory_space=pltpu.MemorySpace.SMEM),     # [alpha, beta]
            pl.BlockSpec((D, t_tile), lambda i: (0, i)),           # t^T freq tile
            pl.BlockSpec((Bcp, D), lambda i: (0, 0)),              # resident features
        ],
        out_specs=pl.BlockSpec((8, 128), lambda i: (i, 0)),        # per-tile partial
        compiler_params=pltpu.CompilerParams(
            dimension_semantics=("parallel",)),
        cost_estimate=cost,
    )(ab, t_T, feat_cat)

    return jnp.sum(partials[::8, 0]) / T


def cf_loss(feat_tg, feat, t, alpha_for_loss=0.5, beta_for_loss=0.5,
            max_epoch=120, epoch=0):
    """JAX/Pallas equivalent of CFLossFunc.forward(feat_tg, feat, t, epoch=epoch).

    The update_alpha_beta schedule is computed as runtime scalars and fed to
    the kernel through SMEM, so varying `epoch` never recompiles the kernel.
    """
    epoch_f = jnp.asarray(epoch, jnp.float32)
    max_epoch_f = jnp.asarray(max_epoch, jnp.float32)
    alpha = jnp.where(
        epoch_f < max_epoch_f,
        jnp.asarray(alpha_for_loss, jnp.float32) * (1.0 - epoch_f / max_epoch_f),
        0.0)
    beta = 1.0 - alpha
    ab = jnp.stack([alpha, beta]).astype(jnp.float32)
    return _cf_loss_impl(ab, feat_tg, feat, t)


def cf_loss_ref(feat_tg, feat, t, alpha=0.5, beta=0.5):
    """Pure-JAX reference for sanity checking."""
    tx = t @ feat.T
    ttg = t @ feat_tg.T
    xr, xi = jnp.mean(jnp.cos(tx), 1), jnp.mean(jnp.sin(tx), 1)
    tr, ti = jnp.mean(jnp.cos(ttg), 1), jnp.mean(jnp.sin(ttg), 1)
    xn = jnp.sqrt(xr * xr + xi * xi)
    tn = jnp.sqrt(tr * tr + ti * ti)
    amp = (tn - xn) ** 2
    pha = jnp.maximum(2.0 * (tn * xn - xr * tr - xi * ti), 1e-12)
    return jnp.mean(jnp.sqrt(alpha * amp + beta * pha))


if __name__ == "__main__":
    key = jax.random.PRNGKey(0)
    k1, k2, k3 = jax.random.split(key, 3)

    # cfd_t_batchsize x feature_dim; small, deliberately non-multiple batch
    # sizes so the sublane-padding path (pad-row correction) is exercised.
    T, D = 384, 32
    B1, B2 = 7, 5          # target / synthetic batch sizes

    feat_tg = jax.random.normal(k1, (B1, D), dtype=jnp.float32)
    feat = jax.random.normal(k2, (B2, D), dtype=jnp.float32)
    t = jax.random.normal(k3, (T, D), dtype=jnp.float32)

    # T=384 -> t_tile=256, two grid tiles (megacore split) + padded last tile.
    loss0 = jax.block_until_ready(cf_loss(feat_tg, feat, t, epoch=0))
    ref0 = jax.block_until_ready(cf_loss_ref(feat_tg, feat, t, alpha=0.5, beta=0.5))
    assert jnp.allclose(loss0, ref0, rtol=1e-4, atol=1e-4), (loss0, ref0)

    # Different epoch => different runtime alpha/beta, same compiled kernel.
    loss1 = jax.block_until_ready(cf_loss(feat_tg, feat, t, epoch=60))
    ref1 = jax.block_until_ready(cf_loss_ref(feat_tg, feat, t, alpha=0.25, beta=0.75))
    assert jnp.allclose(loss1, ref1, rtol=1e-4, atol=1e-4), (loss1, ref1)

    print("KERNEL_OK")
</pallas_src>

<mosaic_0001>
module attributes {stable_mosaic.version = 11 : i64} {
  func.func @cfd_kernel(%arg0: i32, %arg1: memref<2xf32, #tpu.memory_space<smem>>, %arg2: memref<32x256xf32, #tpu.memory_space<vmem>>, %arg3: memref<16x32xf32, #tpu.memory_space<vmem>>, %arg4: memref<8x128xf32, #tpu.memory_space<vmem>>) attributes {dimension_semantics = [#tpu.dimension_semantics<parallel>], iteration_bounds = array<i64: 2>, scalar_prefetch = 0 : i64, scratch_operands = 0 : i64, tpu.core_type = #tpu.core_type<tc>, window_params = [{transform_indices = @transform_0, window_bounds = array<i64: 2>}, {transform_indices = @transform_1, window_bounds = array<i64: 32, 256>}, {pipeline_mode = #tpu.pipeline_mode<synchronous>, transform_indices = @transform_2, window_bounds = array<i64: 16, 32>}, {transform_indices = @transform_3, window_bounds = array<i64: 8, 128>}]} {
    %c0 = arith.constant 0 : index
    %c0_0 = arith.constant 0 : index
    %0 = vector.load %arg3[%c0, %c0_0] : memref<16x32xf32, #tpu.memory_space<vmem>>, vector<16x32xf32>
    %c0_1 = arith.constant 0 : index
    %c0_2 = arith.constant 0 : index
    %1 = vector.load %arg2[%c0_1, %c0_2] : memref<32x256xf32, #tpu.memory_space<vmem>>, vector<32x256xf32>
    %cst = arith.constant dense<0.000000e+00> : vector<16x256xf32>
    %2 = tpu.matmul %0, %1, %cst {dimension_numbers = #tpu.dot_dimension_numbers<[1], [0], [0], [1], [0, 0, 1, 1], [], []>} : vector<16x32xf32>, vector<32x256xf32>, vector<16x256xf32> -> vector<16x256xf32>
    %3 = math.cos %2 : vector<16x256xf32>
    %4 = math.sin %2 : vector<16x256xf32>
    %5 = vector.extract_strided_slice %3 {offsets = [0, 0], sizes = [8, 256], strides = [1, 1]} : vector<16x256xf32> to vector<8x256xf32>
    %cst_3 = arith.constant dense<0.000000e+00> : vector<256xf32>
    %6 = vector.multi_reduction <add>, %5, %cst_3 [0] : vector<8x256xf32> to vector<256xf32>
    %7 = vector.shape_cast %6 : vector<256xf32> to vector<1x256xf32>
    %cst_4 = arith.constant 3.000000e+00 : f32
    %8 = vector.broadcast %cst_4 : f32 to vector<1x256xf32>
    %9 = arith.subf %7, %8 : vector<1x256xf32>
    %cst_5 = arith.constant 2.000000e-01 : f32
    %10 = vector.broadcast %cst_5 : f32 to vector<1x256xf32>
    %11 = arith.mulf %9, %10 : vector<1x256xf32>
    %12 = vector.extract_strided_slice %4 {offsets = [0, 0], sizes = [8, 256], strides = [1, 1]} : vector<16x256xf32> to vector<8x256xf32>
    %cst_6 = arith.constant dense<0.000000e+00> : vector<256xf32>
    %13 = vector.multi_reduction <add>, %12, %cst_6 [0] : vector<8x256xf32> to vector<256xf32>
    %14 = vector.shape_cast %13 : vector<256xf32> to vector<1x256xf32>
    %cst_7 = arith.constant 2.000000e-01 : f32
    %15 = vector.broadcast %cst_7 : f32 to vector<1x256xf32>
    %16 = arith.mulf %14, %15 : vector<1x256xf32>
    %17 = vector.extract_strided_slice %3 {offsets = [8, 0], sizes = [8, 256], strides = [1, 1]} : vector<16x256xf32> to vector<8x256xf32>
    %cst_8 = arith.constant dense<0.000000e+00> : vector<256xf32>
    %18 = vector.multi_reduction <add>, %17, %cst_8 [0] : vector<8x256xf32> to vector<256xf32>
    %19 = vector.shape_cast %18 : vector<256xf32> to vector<1x256xf32>
    %cst_9 = arith.constant 1.000000e+00 : f32
    %20 = vector.broadcast %cst_9 : f32 to vector<1x256xf32>
    %21 = arith.subf %19, %20 : vector<1x256xf32>
    %cst_10 = arith.constant 0.142857149 : f32
    %22 = vector.broadcast %cst_10 : f32 to vector<1x256xf32>
    %23 = arith.mulf %21, %22 : vector<1x256xf32>
    %24 = vector.extract_strided_slice %4 {offsets = [8, 0], sizes = [8, 256], strides = [1, 1]} : vector<16x256xf32> to vector<8x256xf32>
    %cst_11 = arith.constant dense<0.000000e+00> : vector<256xf32>
    %25 = vector.multi_reduction <add>, %24, %cst_11 [0] : vector<8x256xf32> to vector<256xf32>
    %26 = vector.shape_cast %25 : vector<256xf32> to vector<1x256xf32>
    %cst_12 = arith.constant 0.142857149 : f32
    %27 = vector.broadcast %cst_12 : f32 to vector<1x256xf32>
    %28 = arith.mulf %26, %27 : vector<1x256xf32>
    %29 = arith.mulf %11, %11 : vector<1x256xf32>
    %30 = arith.mulf %16, %16 : vector<1x256xf32>
    %31 = arith.addf %29, %30 : vector<1x256xf32>
    %32 = math.sqrt %31 : vector<1x256xf32>
    %33 = arith.mulf %23, %23 : vector<1x256xf32>
    %34 = arith.mulf %28, %28 : vector<1x256xf32>
    %35 = arith.addf %33, %34 : vector<1x256xf32>
    %36 = math.sqrt %35 : vector<1x256xf32>
    %37 = arith.subf %36, %32 : vector<1x256xf32>
    %38 = arith.mulf %37, %37 : vector<1x256xf32>
    %39 = arith.mulf %36, %32 : vector<1x256xf32>
    %40 = arith.mulf %11, %23 : vector<1x256xf32>
    %41 = arith.subf %39, %40 : vector<1x256xf32>
    %42 = arith.mulf %16, %28 : vector<1x256xf32>
    %43 = arith.subf %41, %42 : vector<1x256xf32>
    %cst_13 = arith.constant 2.000000e+00 : f32
    %44 = vector.broadcast %cst_13 : f32 to vector<1x256xf32>
    %45 = arith.mulf %44, %43 : vector<1x256xf32>
    %cst_14 = arith.constant 9.99999996E-13 : f32
    %46 = vector.broadcast %cst_14 : f32 to vector<1x256xf32>
    %47 = arith.maximumf %45, %46 : vector<1x256xf32>
    %c0_15 = arith.constant 0 : index
    %48 = memref.load %arg1[%c0_15] : memref<2xf32, #tpu.memory_space<smem>>
    %c1 = arith.constant 1 : index
    %49 = memref.load %arg1[%c1] : memref<2xf32, #tpu.memory_space<smem>>
    %50 = vector.broadcast %48 : f32 to vector<1x256xf32>
    %51 = arith.mulf %50, %38 : vector<1x256xf32>
    %52 = vector.broadcast %49 : f32 to vector<1x256xf32>
    %53 = arith.mulf %52, %47 : vector<1x256xf32>
    %54 = arith.addf %51, %53 : vector<1x256xf32>
    %55 = math.sqrt %54 : vector<1x256xf32>
    %56 = tpu.iota {dimensions = array<i32: 1>} : vector<1x256xi32>
    %c256_i32 = arith.constant 256 : i32
    %57 = arith.muli %arg0, %c256_i32 : i32
    %58 = vector.broadcast %57 : i32 to vector<1x256xi32>
    %59 = arith.addi %58, %56 : vector<1x256xi32>
    %c384_i32 = arith.constant 384 : i32
    %60 = vector.broadcast %c384_i32 : i32 to vector<1x256xi32>
    %61 = arith.cmpi slt, %59, %60 : vector<1x256xi32>
    %cst_16 = arith.constant 0.000000e+00 : f32
    %62 = vector.broadcast %cst_16 : f32 to vector<1x256xf32>
    %63 = arith.select %61, %55, %62 : vector<1x256xi1>, vector<1x256xf32>
    %64 = vector.shape_cast %63 : vector<1x256xf32> to vector<1x1x256xf32>
    %cst_17 = arith.constant dense<0.000000e+00> : vector<1xf32>
    %65 = vector.multi_reduction <add>, %64, %cst_17 [1, 2] : vector<1x1x256xf32> to vector<1xf32>
    %66 = vector.shape_cast %65 : vector<1xf32> to vector<1x1x1xf32>
    %67 = vector.extract %66[0, 0, 0] : f32 from vector<1x1x1xf32>
    %68 = vector.broadcast %67 : f32 to vector<8x128xf32>
    %c0_18 = arith.constant 0 : index
    %c0_19 = arith.constant 0 : index
    %69 = vector.load %arg4[%c0_18, %c0_19] : memref<8x128xf32, #tpu.memory_space<vmem>>, vector<8x128xf32>
    tpu.vector_store %arg4[%c0_18, %c0_19], %68 {strides = array<i32>} : memref<8x128xf32, #tpu.memory_space<vmem>>, vector<8x128xf32>,
    return
  }
  func.func @transform_0(%arg0: i32) -> i32 {
    %c0_i32 = arith.constant 0 : i32
    %c0_i32_0 = arith.constant 0 : i32
    return %c0_i32 : i32
  }
  func.func @transform_1(%arg0: i32) -> (i32, i32) {
    %c0_i32 = arith.constant 0 : i32
    %c0_i32_0 = arith.constant 0 : i32
    return %c0_i32, %arg0 : i32, i32
  }
  func.func @transform_2(%arg0: i32) -> (i32, i32) {
    %c0_i32 = arith.constant 0 : i32
    %c0_i32_0 = arith.constant 0 : i32
    %c0_i32_1 = arith.constant 0 : i32
    return %c0_i32, %c0_i32_0 : i32, i32
  }
  func.func @transform_3(%arg0: i32) -> (i32, i32) {
    %c0_i32 = arith.constant 0 : i32
    %c0_i32_0 = arith.constant 0 : i32
    return %arg0, %c0_i32 : i32, i32
  }
}

</mosaic_0001>

<bundles_post_ra>
// kernel: tpu_custom_call.1
= control target key start
LH: loop header
LB: loop body
LE: loop exit
PB: predicated region body
PF: predicated region fallthrough
CT: control target
= control target key end

     0   :  { %8 = vsyncpa [#allocation5], 0  ;;  %s2349_s0 = inlined_call_operand.hbm [shape: f32[2], index: 0, kind: input, shape index: {}]   ;;  %s2350_s1 = inlined_call_operand.hbm [shape: f32[32,512], index: 1, kind: input, shape index: {}]   ;;  %s2351_s2 = inlined_call_operand.hbm [shape: f32[16,32], index: 2, kind: input, shape index: {}]   ;;  %s2352_s3 = inlined_call_operand.hbm [shape: f32[16,128], index: 3, kind: output, shape index: {}]  }
   0x1   :  { %9 = vsyncpa [#allocation3], 0 }
   0x2   :  { %11 = vsyncpa [#allocation3 + $0x1], 0 }
   0x3   :  { %12 = vsyncpa [#allocation8], 0 }
   0x4   :  { %13 = vsyncpa [#allocation4], 0 }
   0x5   :  { %15 = vsyncpa [#allocation4 + $0x1], 0  ;;  %s1779_s12 = smov 0   ;;  %s1781_s13 = smov 0  }
   0x6   :  { %s1783_s14 = smov 0   ;;  %s1785_s15 = smov 0  }
   0x7 LB: > { %s1800_s16 = sadd.s32 4294967295, %s1741_s15   ;;  %s1413_s17 = sadd.s32 4294967294, %s1741_s15   ;;  %s1741_s15 = sphi %s1785_s15, %s2386_s15   ;;  %s1737_s14 = sphi %s1783_s14, %s2385_s14   ;;  %s1733_s13 = sphi %s1781_s13, %s2384_s13   ;;  %s1729_s12 = sphi %s1779_s12, %s2383_s12  }
   0x8   : > { %s1804_s18 = sadd.s32 1, %s1741_s15   ;;  %s49_s19 = sadd.s32 1, %s1737_s14 }
   0x9   : > { %s46_s20 = ssub.s32 %s1741_s15, %s1804_s18  ;;  %p56_p0 = scmp.ne.s32.totalorder %s1737_s14, %s1733_s13 }
   0xa   : > { %p47_p1 = scmp.eq.s32.totalorder %s46_s20, 0  ;;  %p57_p2 = scmp.eq.s32.totalorder %s1741_s15, 0 }
   0xb   : > { %p62_p3 = scmp.ne.s32.totalorder %s1733_s13, %s1729_s12  ;;  %p2353_p4 = scmp.eq.s32.totalorder %s1800_s16, 0 }
   0xc   : > { %s1816_s21 = scalar_select %p47_p1, %s1737_s14, %s49_s19  }
   0xd   : > { %p1818_p5 = por %p57_p2, %p56_p0  ;;  %p1824_p6 = por %p2353_p4, %p62_p3 }
   0xe   : > { %p107_p7 = scmp.eq.s32.totalorder %s1800_s16, 1  ;;  %p113_p8 = scmp.eq.s32.totalorder %s1413_s17, 1 }
   0xf   : > { %s2357_s22 = scalar_select %p1818_p5, 1, 0 }
  0x10   : > { %s2358_s23 = scalar_select %p1824_p6, 1, 0 }
  0x11   : > { %p1414_p9 = scmp.ge.s32.totalorder %s1741_s15, 1  ;;  %p120_p10 = scmp.lt.s32.totalorder %s1741_s15, 3 }
  0x12   : > { %p1831_p11 = por %p107_p7, %p56_p0  ;;  %p1835_p12 = por %p113_p8, %p62_p3 }
  0x13   : > { %p1839_p13 = pnand %p1414_p9, %p120_p10  ;;  %p1526_p4 = scmp.lt.s32.totalorder %s1741_s15, 2 }
  0x14   : > { %s2359_s24 = scalar_select %p1831_p11, 1, 0 }
  0x15   : > { %s2360_s25 = scalar_select %p1835_p12, 1, 0 }
  0x16   : > { %s2361_s26 = scalar_select %p1839_p13, 1, 0 }
  0x17   : > { %p1509_p2 = pneg %p1839_p13  ;;  %p2362_p6 = scmp.eq.s32.totalorder %s1800_s16, 0 }
  0x18   : > { %p2364_p0 = scmp.ne.s32.totalorder %s2357_s22, 0  ;;  %s1743_s29 = smov [#allocation7]  }
  0x19   : > { %p1849_p5 = pnand %p1509_p2, %p2362_p6  ;;  %s141_s30 = sshll.u32 %s1743_s29, 4  ;;  %s142_s30 = int_to_ptr.vmem [resolvable:$true] %s141_s30 }
  0x1a   : > { %p1855_p3 = pnand %p1526_p4, %p2364_p0  ;;  %s1744_s4 = smov [#allocation2]  }
  0x1b   : > { %1512 = dma.hbm_to_smem (!%p1849_p5), %s2349_s0, 16, %s1744_s4, [#allocation5]  }
  0x1c   : > { %s155_s7 = sand.u32 1, %s1737_s14   ;;  %p1617_p6 = pneg %p1849_p5 }
  0x1d   : > { %s1626_s8 = scalar_lea.vmem %s142_s30, 256  ;;  %p1634_p4 = scmp.lt.s32.totalorder %s142_s30, %s142_s30 }
  0x1e   : > { %p1627_p7 = scmp.ne.s32.totalorder %s142_s30, %s1626_s8  ;;  %p1635_p10 = scmp.lt.s32.totalorder %s1626_s8, %s1626_s8 }
  0x20   : > { %p1629_p8 = pnand %p1627_p7, %p1617_p6  ;;  %p1636_p2 = por %p1635_p10, %p1634_p4 }
  0x22   : > { %p1630_p9 = pneg %p1629_p8 }
  0x24   : > { %p1637_p0 = pnand %p1636_p2, %p1630_p9 }
  0x26   : > { %1640 = shalt.err (!%p1637_p0)
}
  0x27   : > { %s1745_s9 = smov 128   ;;  %s1746_s10 = smov 8  }
  0x28   : > { %1515 = dma.hbm_to_vmem [thread:$0]  (!%p1849_p5), %s2351_s2, 256, %s142_s30, [#allocation8], %s1745_s9, %s1745_s9, %s1746_s10  }
  0x29   : > { %s1418_s19 = sshll.u32 %s155_s7, 6  ;;  %s1470_s20 = sshll.u32 %s1741_s15, 8 }
  0x2a   : > { %s1876_s4 = scalar_lea.hbm %s2350_s1, %s1470_s20  ;;  %s159_s5 = scalar_lea.vmem [#allocation6], %s1418_s19 }
  0x2b   : > { %s166_s6 = sshll.u32 %s159_s5, 4  ;;  %s1880_s8 = scalar_lea.sflag [#allocation3], %s155_s7  ;;  %s1878_s6 = int_to_ptr.vmem [resolvable:$true] %s166_s6 }
  0x2c   : > { %s1641_s27 = scalar_lea.hbm %s1876_s4, 1024  ;;  %p1643_p5 = pneg %p1855_p3 }
  0x2d   : > { %p1642_p6 = scmp.ne.s32.totalorder %s1876_s4, %s1641_s27  ;;  %s1646_s10 = scalar_lea.hbm %s2350_s1, 2048 }
  0x2e   : > { %p1647_p9 = scmp.lt.s32.totalorder %s1876_s4, %s2350_s1  ;;  %p1648_p4 = scmp.lt.s32.totalorder %s1646_s10, %s1641_s27 }
  0x2f   : > { %p1644_p7 = pnand %p1643_p5, %p1642_p6 }
  0x30   : > { %p1649_p10 = por %p1648_p4, %p1647_p9 }
  0x31   : > { %p1645_p8 = pneg %p1644_p7 }
  0x33   : > { %p1650_p2 = pnand %p1649_p10, %p1645_p8 }
  0x35   : > { %1653 = shalt.err (!%p1650_p2)
}
  0x36   : > { %s1654_s7 = scalar_lea.vmem %s1878_s6, 1024  ;;  %s1747_s19 = smov [#allocation6]  }
  0x37   : > { %p1655_p0 = scmp.ne.s32.totalorder %s1878_s6, %s1654_s7  ;;  %s1659_s20 = sshll.u32 %s1747_s19, 4  ;;  %s1660_s20 = int_to_ptr.vmem [resolvable:$false] %s1659_s20 }
  0x38   : > { %s1661_s22 = scalar_lea.vmem %s1660_s20, 2048  ;;  %p1662_p7 = scmp.lt.s32.totalorder %s1878_s6, %s1660_s20 }
  0x39   : > { %p1657_p1 = pnand %p1655_p0, %p1643_p5  ;;  %p1663_p12 = scmp.lt.s32.totalorder %s1661_s22, %s1654_s7 }
  0x3b   : > { %p1658_p6 = pneg %p1657_p1  ;;  %p1664_p11 = por %p1663_p12, %p1662_p7 }
  0x3d   : > { %p1665_p13 = pnand %p1664_p11, %p1658_p6 }
  0x3f   : > { %1668 = shalt.err (!%p1665_p13)
}
  0x40   : > { %s1748_s29 = smov 512   ;;  %s1749_s5 = smov 256  }
  0x41   : > { %s1750_s27 = smov 16   ;;  %p2366_p1 = scmp.ne.s32.totalorder %s2361_s26, 0 }
  0x42   : > { %1519 = dma.hbm_to_vmem [thread:$0]  (!%p1855_p3), %s1876_s4, 1024, %s1878_s6, %s1880_s8, %s1748_s29, %s1749_s5, %s1750_s27  }
  0x43   : > { %178 = sbr.rel (%p2366_p1) target bundleno = 712 (0x2c8), region = 32  ;;  %p2367_p5 = scmp.eq.s32.totalorder (!%p2366_p1), %s1800_s16, 0 }
  0x48   : > { %1712 = dma.done.wait (%p2367_p5), [#allocation5], 16   ;;  %p2368_p8 = pmov %p2367_p5 }
  0x49   : > { %s1908_s30 = sand.u32 1, %s1733_s13   ;;  %p2369_p11 = scmp.ne.s32.totalorder %s2358_s23, 0 }
  0x4a   : > { %1714 = vsyncadd (%p2368_p8), [#allocation5], 4294967280  ;;  %s1423_s9 = sshll.u32 %s1908_s30, 6  ;;  %s185_s10 = scalar_lea.sflag [#allocation3], %s1908_s30 }
  0x4b   : > { %s188_s11 = scalar_lea.vmem [#allocation6], %s1423_s9 }
  0x4c   : > { %1716 = dma.done.wait (%p2369_p11), %s185_s10, 1024  }
  0x4d   : > { %1718 = vsyncadd (%p2369_p11), %s185_s10, 4294966272  ;;  %p2370_p12 = pmov %p2367_p5 }
  0x4e   : > { %p2371_p13 = pmov %p2367_p5 }
  0x4f   : > { %1720 = dma.done.wait (%p2370_p12), [#allocation8], 256  }
  0x50   : > { %1722 = vsyncadd (%p2371_p13), [#allocation8], 4294967040 }
  0x51   : > { %197 = sfence }
  0x52   : > { %v226_v0 = vld [vmem:[%s188_s11 + $0x38] sm:$0xff]  ;;  %v225_v1 = vld [vmem:[%s188_s11 + $0x30] sm:$0xff]  ;;  %v224_v2 = vld [vmem:[%s188_s11 + $0x28] sm:$0xff]  ;;  %vm227_vm0 = vcmask 261120   ;;  %v1751_v10 = vmov 0.0   ;;  %s2298_s23 = sld [smem:[#allocation2 + $0x1]] }
  0x53   : > { %258 = vmatprep.subr.mxu0 %v226_v0  ;;  %1471 = vmatprep.subr.mxu1 %v226_v0  ;;  %v223_v3 = vld [vmem:[%s188_s11 + $0x20] sm:$0xff]  ;;  %v222_v4 = vld [vmem:[%s188_s11 + $0x18] sm:$0xff]  ;;  %v221_v5 = vld [vmem:[%s188_s11 + $0x10] sm:$0xff]  ;;  %v1752_v39 = vmov 683565275   ;;  %s2300_s26 = sld [smem:[#allocation2]] }
  0x54   : > { %259 = vmatpush1.msra.mxu0 %v225_v1  ;;  %1475 = vmatpush1.msra.mxu1 %v225_v1  ;;  %v220_v6 = vld [vmem:[%s188_s11 + $0x8] sm:$0xff]  ;;  %v219_v7 = vld [vmem:[%s188_s11] sm:$0xff]  ;;  %v1753_v43 = vmov 2475754826   ;;  %v1754_v45 = vmov 2131351028  }
  0x55   : > { %260 = vmatprep.subr.mxu0 %v224_v2  ;;  %1472 = vmatprep.subr.mxu1 %v224_v2  ;;  %v217_v8 = vld [vmem:[#allocation7] sm:$0xff]  ;;  %v218_v9 = vld [vmem:[#allocation7 + $0x8] sm:$0xff]  ;;  %v1755_v47 = vmov 2102212464   ;;  %v1756_v49 = vmov 920167782  }
  0x56   : > { %261 = vmatpush1.msra.mxu0 %v223_v3  ;;  %1476 = vmatpush1.msra.mxu1 %v223_v3  ;;  %v1757_v56 = vmov 1326507024   ;;  %s1465_s28 = sshll.u32 %s1800_s16, 8  ;;  %s1425_s4 = sshll.u32 %s1908_s30, 3 }
  0x57   : > { %262 = vmatprep.subr.mxu0 %v222_v4  ;;  %1473 = vmatprep.subr.mxu1 %v222_v4  ;;  %s215_s6 = scalar_lea.vmem [#allocation9], %s1425_s4  ;;  %s1467_s17 = sshll.u32 %s1800_s16, 7 }
  0x58   : > { %263 = vmatpush1.msra.mxu0 %v221_v5  ;;  %1477 = vmatpush1.msra.mxu1 %v221_v5  ;;  %s1321_s8 = sshll.u32 %s215_s6, 4  ;;  %s1319_s22 = scalar_lea.hbm %s2352_s3, %s1467_s17  ;;  %s2309_s8 = int_to_ptr.vmem [resolvable:$true] %s1321_s8 }
  0x59   : > { %264 = vmatprep.subr.mxu0 %v220_v6  ;;  %1474 = vmatprep.subr.mxu1 %v220_v6  ;;  %s1308_s29 = scalar_lea.sflag [#allocation4], %s1908_s30  ;;  %s1669_s5 = scalar_lea.vmem %s2309_s8, 128 }
  0x5a   : > { %265 = vmatpush1.msra.mxu0 %v219_v7  ;;  %1478 = vmatpush1.msra.mxu1 %v219_v7  ;;  %p1670_p3 = scmp.ne.s32.totalorder %s2309_s8, %s1669_s5  ;;  %p2380_p9 = scmp.ne.s32.totalorder %s2359_s24, 0 }
  0x5b   : > { %298 = vmatprep.mubr.f32.mxu0 %v1751_v10  ;;  %304 = vmatprep.mubr.f32.mxu1 %v1751_v10  ;;  %s1758_s27 = smov [#allocation9]  }
  0x5c   : > { %1426 = vmatmul.mubr.msk.f32.vlgmr.msra.gmra.mxu0 %vm227_vm0, %v217_v8  ;;  %1427 = vmatmul.mubr.msk.f32.vlgmr.msra.gmra.mxu1 %vm227_vm0, %v218_v9  ;;  %p1671_p4 = pnand %p1670_p3, %p2380_p9  ;;  %s1673_s16 = sshll.u32 %s1758_s27, 4  ;;  %s1674_s16 = int_to_ptr.vmem [resolvable:$false] %s1673_s16 }
  0x5d   : > { %s1675_s9 = scalar_lea.vmem %s1674_s16, 256  ;;  %p1676_p2 = scmp.lt.s32.totalorder %s2309_s8, %s1674_s16 }
  0x5e   : > { %p1672_p10 = pneg %p1671_p4  ;;  %p1677_p0 = scmp.lt.s32.totalorder %s1675_s9, %s1669_s5 }
  0x60   : > { %p1678_p6 = por %p1677_p0, %p1676_p2 }
  0x62   : > { %p1679_p7 = pnand %p1678_p6, %p1672_p10 }
 0x11c   : > { %v1920_v11 = vpop.f32.mrf.mxu0  ;;  %v1922_v12 = vpop.f32.mrf.mxu1 }
 0x11d   : > { %v311_v13 = vand.u32 2147483647, %v1920_v11  ;;  %v314_v14 = vand.u32 2139095040, %v1920_v11  ;;  %v517_v15 = vand.u32 2147483647, %v1922_v12  ;;  %v520_v16 = vand.u32 2139095040, %v1922_v12 }
 0x11e   : > { %v1928_v17 = vpop.f32.mrf.mxu0 }
 0x11f   : > { %v315_v18 = vshrl.u32 %v314_v14, 23  ;;  %v318_v19 = vand.u32 8388607, %v311_v13  ;;  %v521_v20 = vshrl.u32 %v520_v16, 23  ;;  %v524_v21 = vand.u32 8388607, %v517_v15 }
 0x120   : > { %v417_v22 = vand.u32 2139095040, %v1928_v17 }
 0x121   : > { %v1428_v23 = vadd.s32 4294967169, %v315_v18  ;;  %v1436_v24 = vadd.s32 4294967169, %v521_v20  ;;  %v319_v27 = vor.u32 8388608, %v318_v19  ;;  %v525_v28 = vor.u32 8388608, %v524_v21 }
 0x122   : > { %v418_v25 = vshrl.u32 %v417_v22, 23 }
 0x123   : > { %v321_v26 = vadd.s32 1, %v1428_v23  ;;  %v527_v29 = vadd.s32 1, %v1436_v24  ;;  %v1935_v35 = vshll.u32 %v319_v27, 8  ;;  %v1937_v36 = vshll.u32 %v525_v28, 8 }
 0x124   : > { %v1432_v30 = vadd.s32 4294967169, %v418_v25 }
 0x125   : > { %vm322_vm1 = vcmp.gt.s32.totalorder %v321_v26, 0  ;;  %vm528_vm2 = vcmp.gt.s32.totalorder %v527_v29, 0 }
 0x126   : > { %v323_v31 = vsel %vm322_vm1, %v321_v26, 0  ;;  %v529_v34 = vsel %vm528_vm2, %v527_v29, 0  ;;  %v1939_v37 = vadd.s32 1, %v1432_v30 }
 0x127   : > { %v324_v32 = vshrl.u32 %v323_v31, 5  ;;  %v325_v33 = vand.u32 31, %v323_v31  ;;  %v1942_v41 = vshrl.u32 %v529_v34, 5  ;;  %v531_v42 = vand.u32 31, %v529_v34 }
 0x128   : > { %vm425_vm7 = vcmp.gt.s32.totalorder %v1939_v37, 0 }
 0x129   : > { %v326_v38 = vsub.s32 32, %v325_v33  ;;  %v328_v40 = vshll.u32 %v1752_v39, %v325_v33  ;;  %v331_v44 = vshll.u32 %v1753_v43, %v325_v33  ;;  %v334_v46 = vshll.u32 %v1754_v45, %v325_v33 }
 0x12a   : > { %v337_v48 = vshll.u32 %v1755_v47, %v325_v33  ;;  %v340_v50 = vshll.u32 %v1756_v49, %v325_v33  ;;  %vm343_vm3 = vcmp.lt.s32.totalorder %v324_v32, 1  ;;  %vm344_vm4 = vcmp.lt.s32.totalorder %v324_v32, 2 }
 0x12b   : > { %v329_v51 = vshrl.u32 %v1753_v43, %v326_v38  ;;  %v332_v52 = vshrl.u32 %v1754_v45, %v326_v38  ;;  %v335_v53 = vshrl.u32 %v1755_v47, %v326_v38  ;;  %v327_v54 = vshrl.u32 %v1752_v39, %v326_v38 }
 0x12c   : > { %v338_v55 = vshrl.u32 %v1756_v49, %v326_v38  ;;  %v341_v57 = vshrl.u32 %v1757_v56, %v326_v38  ;;  %v532_v61 = vsub.s32 32, %v531_v42  ;;  %vm345_vm5 = vcmp.lt.s32.totalorder %v324_v32, 3 }
 0x12d   : > { %v330_v58 = vor.u32 %v329_v51, %v328_v40  ;;  %v333_v59 = vor.u32 %v332_v52, %v331_v44  ;;  %v336_v60 = vor.u32 %v335_v53, %v334_v46  ;;  %vm346_vm6 = vcmp.lt.s32.totalorder %v324_v32, 4 }
 0x12e   : > { %v339_v62 = vor.u32 %v338_v55, %v337_v48  ;;  %v342_v63 = vor.u32 %v341_v57, %v340_v50  ;;  %v534_v7 = vshll.u32 %v1752_v39, %v531_v42  ;;  %v535_v10 = vshrl.u32 %v1753_v43, %v532_v61 }
 0x12f   : > { %v347_v0 = vsel %vm343_vm3, %v327_v54, %v330_v58  ;;  %v348_v1 = vsel %vm346_vm6, %v336_v60, 2102212464  ;;  %v351_v2 = vsel %vm343_vm3, %v330_v58, %v333_v59  ;;  %v355_v3 = vsel %vm343_vm3, %v333_v59, %v336_v60 }
 0x130   : > { %v349_v4 = vsel %vm345_vm5, %v333_v59, %v348_v1  ;;  %v352_v5 = vsel %vm346_vm6, %v339_v62, 920167782  ;;  %v356_v6 = vsel %vm346_vm6, %v342_v63, 1326507024  ;;  %v537_v14 = vshll.u32 %v1753_v43, %v531_v42 }
 0x131   : > { %v353_v8 = vsel %vm345_vm5, %v336_v60, %v352_v5  ;;  %v357_v9 = vsel %vm345_vm5, %v339_v62, %v356_v6  ;;  %v350_v16 = vsel %vm344_vm4, %v347_v0, %v349_v4  ;;  %v538_v20 = vshrl.u32 %v1754_v45, %v532_v61 }
 0x132   : > { %v354_v18 = vsel %vm344_vm4, %v351_v2, %v353_v8  ;;  %v358_v19 = vsel %vm344_vm4, %v355_v3, %v357_v9  ;;  %v536_v25 = vor.u32 %v535_v10, %v534_v7  ;;  %v540_v27 = vshll.u32 %v1754_v45, %v531_v42  ;;  %v2016_v9 = vpop.f32.mrf.mxu1 }
 0x133   : > { %v1966_v21 = vmul.u32.u64.low %v1935_v35, %v358_v19  ;;  %v1967_v22 = vmul.u32.u64.high %v1935_v35, %v358_v19, %v1966_v21  ;;  %v1970_v23 = vmul.u32.u64.low %v1935_v35, %v354_v18  ;;  %v1971_v24 = vmul.u32.u64.high %v1935_v35, %v354_v18, %v1970_v23 }
 0x134   : > { %v539_v26 = vor.u32 %v538_v20, %v537_v14  ;;  %v541_v28 = vshrl.u32 %v1755_v47, %v532_v61  ;;  %v533_v29 = vshrl.u32 %v1752_v39, %v532_v61  ;;  %v543_v30 = vshll.u32 %v1755_v47, %v531_v42 }
 0x135   : > { %v544_v31 = vshrl.u32 %v1756_v49, %v532_v61  ;;  %v547_v32 = vshrl.u32 %v1757_v56, %v532_v61  ;;  %v366_v33 = vmul.u32 %v1935_v35, %v350_v16  ;;  %v546_v38 = vshll.u32 %v1756_v49, %v531_v42 }
 0x136   : > { %v542_v34 = vor.u32 %v541_v28, %v540_v27  ;;  %vm549_vm8 = vcmp.lt.s32.totalorder %v1942_v41, 1  ;;  %vm368_vm9 = vc.u32 %v1967_v22, %v1970_v23  ;;  %v369_v40 = vadd.s32 1, %v1971_v24 }
 0x137   : > { %v545_v44 = vor.u32 %v544_v31, %v543_v30  ;;  %vm550_vm10 = vcmp.lt.s32.totalorder %v1942_v41, 2  ;;  %v548_v46 = vor.u32 %v547_v32, %v546_v38  ;;  %vm551_vm11 = vcmp.lt.s32.totalorder %v1942_v41, 3 }
 0x138   : > { %vm552_vm12 = vcmp.lt.s32.totalorder %v1942_v41, 4  ;;  %v557_v48 = vsel %vm549_vm8, %v536_v25, %v539_v26  ;;  %v370_v35 = vsel %vm368_vm9, %v369_v40, %v1971_v24  ;;  %v561_v51 = vsel %vm549_vm8, %v539_v26, %v542_v34 }
 0x139   : > { %v554_v50 = vsel %vm552_vm12, %v542_v34, 2102212464  ;;  %v558_v42 = vsel %vm552_vm12, %v545_v44, 920167782  ;;  %v371_v52 = vadd.s32 %v370_v35, %v366_v33  ;;  %v553_v53 = vsel %vm549_vm8, %v533_v29, %v536_v25 }
 0x13a   : > { %v559_v54 = vsel %vm551_vm11, %v542_v34, %v558_v42  ;;  %v562_v55 = vsel %vm552_vm12, %v548_v46, 1326507024  ;;  %v555_v57 = vsel %vm551_vm11, %v539_v26, %v554_v50  ;;  %v426_v60 = vsel %vm425_vm7, %v1939_v37, 0 }
 0x13b   : > { %v560_v58 = vsel %vm550_vm10, %v557_v48, %v559_v54  ;;  %v563_v59 = vsel %vm551_vm11, %v545_v44, %v562_v55  ;;  %v372_v61 = vadd.s32 536870912, %v371_v52  ;;  %v556_v4 = vsel %vm550_vm10, %v553_v53, %v555_v57 }
 0x13c   : > { %v564_v62 = vsel %vm550_vm10, %v561_v51, %v563_v59  ;;  %v1998_v63 = vmul.u32.u64.low %v1937_v36, %v560_v58  ;;  %v1999_v0 = vmul.u32.u64.high %v1937_v36, %v560_v58, %v1998_v63  ;;  %v414_v37 = vand.u32 2147483647, %v1928_v17 }
 0x13d   : > { %v2003_v1 = vmul.u32.u64.low %v1937_v36, %v564_v62  ;;  %v2004_v2 = vmul.u32.u64.high %v1937_v36, %v564_v62, %v2003_v1  ;;  %v2006_v3 = vshrl.u32 %v372_v61, 30  ;;  %v428_v5 = vand.u32 31, %v426_v60 }
 0x13e   : > { %v575_v7 = vadd.s32 1, %v1999_v0  ;;  %v572_v8 = vmul.u32 %v1937_v36, %v556_v4  ;;  %v421_v41 = vand.u32 8388607, %v414_v37  ;;  %v623_v20 = vand.u32 2139095040, %v2016_v9 }
 0x13f   : > { %v374_v6 = vshll.u32 %v2006_v3, 30  ;;  %vm574_vm13 = vc.u32 %v2004_v2, %v1998_v63  ;;  %v429_v18 = vsub.s32 32, %v428_v5  ;;  %v2022_v36 = vshrl.u32 %v426_v60, 5 }
 0x140   : > { %v576_v14 = vsel %vm574_vm13, %v575_v7, %v1999_v0  ;;  %v422_v25 = vor.u32 8388608, %v421_v41  ;;  %v440_v31 = vshll.u32 %v1755_v47, %v428_v5  ;;  %v624_v33 = vshrl.u32 %v623_v20, 23 }
 0x141   : > { %v375_v10 = vsub.s32 %v371_v52, %v374_v6  ;;  %v577_v16 = vadd.s32 %v576_v14, %v572_v8  ;;  %v432_v27 = vshrl.u32 %v1753_v43, %v429_v18  ;;  %v435_v28 = vshrl.u32 %v1754_v45, %v429_v18 }
 0x142   : > { %v438_v29 = vshrl.u32 %v1755_v47, %v429_v18  ;;  %v441_v32 = vshrl.u32 %v1756_v49, %v429_v18  ;;  %v431_v38 = vshll.u32 %v1752_v39, %v428_v5  ;;  %v434_v40 = vshll.u32 %v1753_v43, %v428_v5 }
 0x143   : > { %v377_v19 = vsub.s32 0, %v375_v10  ;;  %v578_v21 = vadd.s32 536870912, %v577_v16  ;;  %v437_v44 = vshll.u32 %v1754_v45, %v428_v5  ;;  %v444_v35 = vshrl.u32 %v1757_v56, %v429_v18 }
 0x144   : > { %v442_v48 = vor.u32 %v441_v32, %v440_v31  ;;  %vm449_vm14 = vcmp.lt.s32.totalorder %v2022_v36, 4  ;;  %v433_v42 = vor.u32 %v432_v27, %v431_v38  ;;  %v436_v51 = vor.u32 %v435_v28, %v434_v40 }
 0x145   : > { %v1429_v24 = vmin.u32 %v377_v19, %v375_v10  ;;  %v2024_v26 = vshrl.u32 %v578_v21, 30  ;;  %v439_v52 = vor.u32 %v438_v29, %v437_v44  ;;  %v443_v53 = vshll.u32 %v1756_v49, %v428_v5 }
 0x146   : > { %v455_v54 = vsel %vm449_vm14, %v442_v48, 920167782  ;;  %v462_v55 = vshll.u32 %v422_v25, 8  ;;  %v367_v57 = vadd.s32 %v1970_v23, %v1967_v22  ;;  %vm446_vm0 = vcmp.lt.s32.totalorder %v2022_v36, 1 }
 0x147   : > { %v379_v30 = vclz %v1429_v24  ;;  %v580_v34 = vshll.u32 %v2024_v26, 30  ;;  %v445_v62 = vor.u32 %v444_v35, %v443_v53  ;;  %vm448_vm1 = vcmp.lt.s32.totalorder %v2022_v36, 3 }
 0x148   : > { %v454_v1 = vsel %vm446_vm0, %v433_v42, %v436_v51  ;;  %v456_v4 = vsel %vm448_vm1, %v439_v52, %v455_v54  ;;  %v1440_v5 = vadd.s32 4294967169, %v624_v33  ;;  %v451_v7 = vsel %vm449_vm14, %v439_v52, 2102212464 }
 0x149   : > { %v1430_v46 = vadd.s32 4294967294, %v379_v30  ;;  %v2037_v50 = vsub.s32 %v577_v16, %v580_v34  ;;  %v430_v14 = vshrl.u32 %v1752_v39, %v429_v18  ;;  %vm447_vm2 = vcmp.lt.s32.totalorder %v2022_v36, 2 }
 0x14a   : > { %v458_v41 = vsel %vm446_vm0, %v436_v51, %v439_v52  ;;  %v457_v20 = vsel %vm447_vm2, %v454_v1, %v456_v4  ;;  %v573_v21 = vadd.s32 %v1998_v63, %v2004_v2  ;;  %v452_v25 = vsel %vm448_vm1, %v436_v51, %v451_v7 }
 0x14b   : > { %vm1431_vm15 = vcmp.lt.s32.totalorder %v1430_v46, 0  ;;  %v583_v59 = vsub.s32 0, %v2037_v50  ;;  %v450_v18 = vsel %vm446_vm0, %v430_v14, %v433_v42  ;;  %v630_v30 = vadd.s32 1, %v1440_v5 }
 0x14c   : > { %v382_v58 = vsel %vm1431_vm15, 0, %v1430_v46  ;;  %v2072_v32 = vmul.u32.u64.low %v462_v55, %v457_v20  ;;  %v2073_v33 = vmul.u32.u64.high %v462_v55, %v457_v20, %v2072_v32  ;;  %v453_v46 = vsel %vm447_vm2, %v450_v18, %v452_v25 }
 0x14d   : > { %v383_v60 = vsub.s32 32, %v382_v58  ;;  %v387_v61 = vsub.s32 4294967266, %v382_v58  ;;  %v1437_v0 = vmin.u32 %v583_v59, %v2037_v50  ;;  %v384_v22 = vshll.u32 %v375_v10, %v382_v58 }
 0x14e   : > { %v459_v10 = vsel %vm449_vm14, %v445_v62, 1326507024  ;;  %vm631_vm4 = vcmp.gt.s32.totalorder %v630_v30, 0  ;;  %v472_v53 = vadd.s32 1, %v2073_v33  ;;  %vm313_vm6 = vcmp.lt.s32.totalorder %v1920_v11, 0 }
 0x14f   : > { %v385_v23 = vshrl.u32 %v367_v57, %v383_v60  ;;  %v388_v6 = vadd.s32 127, %v387_v61  ;;  %v585_v8 = vclz %v1437_v0  ;;  %v460_v29 = vsel %vm448_vm1, %v442_v48, %v459_v10 }
 0x150   : > { %v461_v31 = vsel %vm447_vm2, %v458_v41, %v460_v29  ;;  %v632_v35 = vsel %vm631_vm4, %v630_v30, 0  ;;  %v469_v57 = vmul.u32 %v462_v55, %v453_v46  ;;  %v620_v62 = vand.u32 2147483647, %v2016_v9 }
 0x151   : > { %v386_v16 = vor.u32 %v385_v23, %v384_v22  ;;  %v389_v19 = vshll.u32 %v388_v6, 23  ;;  %v1438_v24 = vadd.s32 4294967294, %v585_v8  ;;  %v634_v58 = vand.u32 31, %v632_v35 }
 0x152   : > { %v2076_v34 = vmul.u32.u64.low %v462_v55, %v461_v31  ;;  %v2077_v38 = vmul.u32.u64.high %v462_v55, %v461_v31, %v2076_v34  ;;  %vm2094_vm7 = vcmp.le.f32.partialorder %v311_v13, 0.7853982  ;;  %vm519_vm8 = vcmp.lt.s32.totalorder %v1922_v12, 0 }
 0x153   : > { %v390_v27 = vor.u32 4788187, %v389_v19  ;;  %v393_v28 = vcvt.s32.f32 %v386_v16  ;;  %vm1439_vm3 = vcmp.lt.s32.totalorder %v1438_v24, 0  ;;  %v2090_v1 = vsub.s32 32, %v634_v58 }
 0x154   : > { %v588_v2 = vsel %vm1439_vm3, 0, %v1438_v24  ;;  %vm471_vm5 = vc.u32 %v2077_v38, %v2072_v32  ;;  %vm2104_vm9 = vcmp.le.f32.partialorder %v517_v15, 0.7853982  ;;  %v627_v13 = vand.u32 8388607, %v620_v62 }
 0x155   : > { %v391_v63 = vand.u32 2147483647, %v390_v27  ;;  %v589_v40 = vsub.s32 32, %v588_v2  ;;  %v593_v44 = vsub.s32 4294967266, %v588_v2  ;;  %v590_v42 = vshll.u32 %v2037_v50, %v588_v2 }
 0x156   : > { %v473_v36 = vsel %vm471_vm5, %v472_v53, %v2073_v33  ;;  %v397_v8 = vsub.s32 4, %v2006_v3  ;;  %v641_v41 = vshrl.u32 %v1754_v45, %v2090_v1  ;;  %v644_v16 = vshrl.u32 %v1755_v47, %v2090_v1 }
 0x157   : > { %v394_v48 = vmul.f32 %v393_v28, %v391_v63  ;;  %v591_v51 = vshrl.u32 %v573_v21, %v589_v40  ;;  %v594_v52 = vadd.s32 127, %v593_v44  ;;  %v474_v61 = vadd.s32 %v473_v36, %v469_v57 }
 0x158   : > { %v2118_v15 = vshrl.u32 %v632_v35, 5  ;;  %v647_v20 = vshrl.u32 %v1756_v49, %v2090_v1  ;;  %v650_v10 = vshrl.u32 %v1757_v56, %v2090_v1  ;;  %v640_v24 = vshll.u32 %v1753_v43, %v634_v58 }
 0x159   : > { %v395_v54 = vxor.u32 2147483648, %v394_v48  ;;  %v592_v59 = vor.u32 %v591_v51, %v590_v42  ;;  %v595_v60 = vshll.u32 %v594_v52, 23  ;;  %v475_v55 = vadd.s32 536870912, %v474_v61 }
 0x15a   : > { %v643_v18 = vshll.u32 %v1754_v45, %v634_v58  ;;  %v638_v27 = vshrl.u32 %v1753_v43, %v2090_v1  ;;  %v646_v28 = vshll.u32 %v1755_v47, %v634_v58  ;;  %v649_v29 = vshll.u32 %v1756_v49, %v634_v58 }
 0x15b   : > { %v396_v50 = vsel %vm313_vm6, %v395_v54, %v394_v48  ;;  %v596_v0 = vor.u32 4788187, %v595_v60  ;;  %v599_v22 = vcvt.s32.f32 %v592_v59  ;;  %v2108_v7 = vshrl.u32 %v475_v55, 30 }
 0x15c   : > { %v399_v23 = vsel %vm2094_vm7, %v1920_v11, %v396_v50  ;;  %v642_v56 = vor.u32 %v641_v41, %v640_v24  ;;  %v645_v31 = vor.u32 %v644_v16, %v643_v18  ;;  %v648_v63 = vor.u32 %v647_v20, %v646_v28 }
 0x15d   : > { %v597_v5 = vand.u32 2147483647, %v596_v0  ;;  %v477_v19 = vshll.u32 %v2108_v7, 30  ;;  %1576 = vcosq.f32 %v399_v23  ;;  %v651_v2 = vor.u32 %v650_v10, %v649_v29 }
 0x15e   : > { %1578 = vsinq.f32 %v399_v23  ;;  %v628_v43 = vor.u32 8388608, %v627_v13  ;;  %v637_v47 = vshll.u32 %v1752_v39, %v634_v58  ;;  %v398_v49 = vsel %vm313_vm6, %v397_v8, %v2006_v3 }
 0x15f   : > { %v600_v14 = vmul.f32 %v599_v22, %v597_v5  ;;  %v2126_v25 = vsub.s32 %v474_v61, %v477_v19  ;;  %v603_v34 = vsub.s32 4, %v2024_v26  ;;  %vm652_vm10 = vcmp.lt.s32.totalorder %v2118_v15, 1 }
 0x160   : > { %v639_v44 = vor.u32 %v638_v27, %v637_v47  ;;  %vm654_vm11 = vcmp.lt.s32.totalorder %v2118_v15, 3  ;;  %vm655_vm12 = vcmp.lt.s32.totalorder %v2118_v15, 4  ;;  %v664_v35 = vsel %vm652_vm10, %v642_v56, %v645_v31 }
 0x161   : > { %v601_v21 = vxor.u32 2147483648, %v600_v14  ;;  %v480_v45 = vsub.s32 0, %v2126_v25  ;;  %v661_v48 = vsel %vm655_vm12, %v648_v63, 920167782  ;;  %v665_v3 = vsel %vm655_vm12, %v651_v2, 1326507024 }
 0x162   : > { %vm653_vm13 = vcmp.lt.s32.totalorder %v2118_v15, 2  ;;  %v666_v42 = vsel %vm654_vm11, %v648_v63, %v665_v3  ;;  %v400_v51 = vsel %vm2094_vm7, 0, %v398_v49  ;;  %v668_v54 = vshll.u32 %v628_v43, 8 }
 0x163   : > { %v602_v30 = vsel %vm519_vm8, %v601_v21, %v600_v14  ;;  %v1433_v40 = vmin.u32 %v480_v45, %v2126_v25  ;;  %v667_v53 = vsel %vm653_vm13, %v664_v35, %v666_v42  ;;  %v660_v57 = vsel %vm652_vm10, %v639_v44, %v642_v56 }
 0x164   : > { %v605_v33 = vsel %vm2104_vm9, %v1922_v12, %v602_v30  ;;  %v662_v58 = vsel %vm654_vm11, %v645_v31, %v661_v48  ;;  %v604_v59 = vsel %vm519_vm8, %v603_v34, %v2024_v26  ;;  %v404_v61 = vand.u32 3, %v400_v51 }
 0x165   : > { %1580 = vcosq.f32 %v605_v33  ;;  %v482_v46 = vclz %v1433_v40  ;;  %v2167_v60 = vmul.u32.u64.low %v668_v54, %v667_v53  ;;  %v2168_v36 = vmul.u32.u64.high %v668_v54, %v667_v53, %v2167_v60 }
 0x166   : > { %1582 = vsinq.f32 %v605_v33  ;;  %v657_v0 = vsel %vm655_vm12, %v645_v31, 2102212464  ;;  %v470_v4 = vadd.s32 %v2072_v32, %v2077_v38  ;;  %v636_v22 = vshrl.u32 %v1752_v39, %v2090_v1 }
 0x167   : > { %v1434_v52 = vadd.s32 4294967294, %v482_v46  ;;  %v663_v26 = vsel %vm653_vm13, %v660_v57, %v662_v58  ;;  %v606_v23 = vsel %vm2104_vm9, 0, %v604_v59  ;;  %v816_v14 = vadd.s32 3, %v400_v51 }
 0x168   : > { %v656_v16 = vsel %vm652_vm10, %v636_v22, %v639_v44  ;;  %v658_v32 = vsel %vm654_vm11, %v642_v56, %v657_v0  ;;  %v2187_v39 = vmul.u32.u64.low %v668_v54, %v663_v26  ;;  %v2188_v1 = vmul.u32.u64.high %v668_v54, %v663_v26, %v2187_v39 }
 0x169   : > { %vm1435_vm14 = vcmp.lt.s32.totalorder %v1434_v52, 0  ;;  %vm406_vm15 = vcmp.eq.s32.totalorder %v404_v61, 0  ;;  %v610_v10 = vand.u32 3, %v606_v23  ;;  %v659_v28 = vsel %vm653_vm13, %v656_v16, %v658_v32 }
 0x16a   : > { %v485_v50 = vsel %vm1435_vm14, 0, %v1434_v52  ;;  %v2172_v55 = vpop.eup %1576  ;;  %vm677_vm0 = vc.u32 %v2168_v36, %v2187_v39  ;;  %vm409_vm1 = vcmp.eq.s32.totalorder %v404_v61, 2  ;;  %v817_v56 = vand.u32 3, %v816_v14 }
 0x16b   : > { %v486_v5 = vsub.s32 32, %v485_v50  ;;  %v490_v13 = vsub.s32 4294967266, %v485_v50  ;;  %v1579_v8 = vpop.eup %1578  ;;  %v487_v38 = vshll.u32 %v2126_v25, %v485_v50  ;;  %v410_v6 = vxor.u32 2147483648, %v2172_v55 }
 0x16c   : > { %v407_v24 = vxor.u32 2147483648, %v1579_v8  ;;  %v1024_v25 = vadd.s32 3, %v606_v23  ;;  %v678_v33 = vadd.s32 1, %v2188_v1  ;;  %vm612_vm2 = vcmp.eq.s32.totalorder %v610_v10, 0 }
 0x16d   : > { %v488_v41 = vshrl.u32 %v470_v4, %v486_v5  ;;  %v491_v19 = vadd.s32 127, %v490_v13  ;;  %v411_v45 = vsel %vm409_vm1, %v410_v6, %v1579_v8  ;;  %vm615_vm3 = vcmp.eq.s32.totalorder %v610_v10, 2 }
 0x16e   : > { %v675_v63 = vmul.u32 %v668_v54, %v659_v28  ;;  %v408_v2 = vsel %vm406_vm15, %v2172_v55, %v407_v24  ;;  %v679_v47 = vsel %vm677_vm0, %v678_v33, %v2188_v1  ;;  %vm403_vm4 = vweird.f32 %v1920_v11 }
 0x16f   : > { %v489_v18 = vor.u32 %v488_v41, %v487_v38  ;;  %v492_v27 = vshll.u32 %v491_v19, 23  ;;  %v1025_v40 = vand.u32 3, %v1024_v25  ;;  %vm405_vm5 = vcmp.lt.s32.totalorder %v404_v61, 2 }
 0x170   : > { %vm609_vm6 = vweird.f32 %v1922_v12  ;;  %v680_v46 = vadd.s32 %v679_v47, %v675_v63  ;;  %v412_v48 = vsel %vm405_vm5, %v408_v2, %v411_v45  ;;  %vm611_vm7 = vcmp.lt.s32.totalorder %v610_v10, 2 }
 0x171   : > { %v493_v31 = vor.u32 4788187, %v492_v27  ;;  %v496_v43 = vcvt.s32.f32 %v489_v18  ;;  %vm2204_vm8 = vcmp.le.f32.partialorder %v414_v37, 0.7853982  ;;  %vm416_vm9 = vcmp.lt.s32.totalorder %v1928_v17, 0 }
 0x172   : > { %v1581_v20 = vpop.eup %1580  ;;  %vm822_vm10 = vcmp.eq.s32.totalorder %v817_v56, 2  ;;  %v681_v51 = vadd.s32 536870912, %v680_v46  ;;  %vm819_vm11 = vcmp.eq.s32.totalorder %v817_v56, 0  ;;  %vm1027_vm12 = vcmp.eq.s32.totalorder %v1025_v40, 0 }
 0x173   : > { %v1583_v21 = vpop.eup %1582  ;;  %v616_v30 = vxor.u32 2147483648, %v1581_v20  ;;  %v494_v15 = vand.u32 2147483647, %v493_v31  ;;  %v824_v52 = vsel %vm822_vm10, %v410_v6, %v1579_v8  ;;  %vm1030_vm13 = vcmp.eq.s32.totalorder %v1025_v40, 2 }
 0x174   : > { %v613_v29 = vxor.u32 2147483648, %v1583_v21  ;;  %v413_v53 = vsel %vm403_vm4, nan, %v412_v48  ;;  %v821_v54 = vsel %vm819_vm11, %v2172_v55, %v407_v24  ;;  %v2214_v57 = vshrl.u32 %v681_v51, 30 }
 0x175   : > { %v617_v34 = vsel %vm615_vm3, %v616_v30, %v1583_v21  ;;  %v497_v44 = vmul.f32 %v496_v43, %v494_v15  ;;  %v1032_v60 = vsel %vm1030_vm13, %v616_v30, %v1583_v21  ;;  %vm818_vm14 = vcmp.lt.s32.totalorder %v817_v56, 2 }
 0x176   : > { %v614_v49 = vsel %vm612_vm2, %v1581_v20, %v613_v29  ;;  %v1029_v59 = vsel %vm1027_vm12, %v1581_v20, %v613_v29  ;;  %v500_v50 = vsub.s32 4, %v2108_v7  ;;  %v683_v0 = vshll.u32 %v2214_v57, 30 }
 0x177   : > { %v618_v3 = vsel %vm611_vm7, %v614_v49, %v617_v34  ;;  %v498_v42 = vxor.u32 2147483648, %v497_v44  ;;  %v825_v55 = vsel %vm818_vm14, %v821_v54, %v824_v52  ;;  %v1139_v4 = vrot.slane %v413_v53, 4 }
 0x178   : > { %v619_v58 = vsel %vm609_vm6, nan, %v618_v3  ;;  %vm1026_vm15 = vcmp.lt.s32.totalorder %v1025_v40, 2  ;;  %v684_v26 = vsub.s32 %v680_v46, %v683_v0  ;;  %v826_v23 = vsel %vm403_vm4, nan, %v825_v55 }
 0x179   : > { %v499_v37 = vsel %vm416_vm9, %v498_v42, %v497_v44  ;;  %v1033_v5 = vsel %vm1026_vm15, %v1029_v59, %v1032_v60  ;;  %v1169_v22 = vrot.slane %v619_v58, 4  ;;  %v501_v13 = vsel %vm416_vm9, %v500_v50, %v2108_v7 }
 0x17a   : > { %v502_v61 = vsel %vm2204_vm8, %v1928_v17, %v499_v37  ;;  %v686_v8 = vsub.s32 0, %v684_v26  ;;  %v1140_v14 = vadd.f32 %v1139_v4, %v413_v53  ;;  %v1034_v41 = vsel %vm609_vm6, nan, %v1033_v5 }
 0x17b   : > { %1584 = vcosq.f32 %v502_v61  ;;  %v1170_v16 = vadd.f32 %v1169_v22, %v619_v58  ;;  %v1155_v38 = vrot.slane %v826_v23, 4  ;;  %v503_v19 = vsel %vm2204_vm8, 0, %v501_v13 }
 0x17c   : > { %1586 = vsinq.f32 %v502_v61  ;;  %v1441_v32 = vmin.u32 %v686_v8, %v684_v26  ;;  %v1185_v1 = vrot.slane %v1034_v41, 4  ;;  %v1141_v6 = vrot.slane %v1140_v14, 2 }
 0x17d   : > { %v1171_v11 = vrot.slane %v1170_v16, 2  ;;  %v507_v10 = vand.u32 3, %v503_v19  ;;  %v1156_v24 = vadd.f32 %v1155_v38, %v826_v23  ;;  %v920_v28 = vadd.s32 3, %v503_v19 }
 0x17e   : > { %v688_v20 = vclz %v1441_v32  ;;  %v1186_v18 = vadd.f32 %v1185_v1, %v1034_v41  ;;  %v1142_v27 = vadd.f32 %v1141_v6, %v1140_v14  ;;  %v676_v63 = vadd.s32 %v2187_v39, %v2168_v36 }
 0x17f   : > { %v1172_v30 = vadd.f32 %v1171_v11, %v1170_v16  ;;  %vm509_vm1 = vcmp.eq.s32.totalorder %v507_v10, 0  ;;  %v1157_v25 = vrot.slane %v1156_v24, 2  ;;  %vm512_vm2 = vcmp.eq.s32.totalorder %v507_v10, 2 }
 0x180   : > { %v1442_v21 = vadd.s32 4294967294, %v688_v20  ;;  %v1187_v45 = vrot.slane %v1186_v18, 2  ;;  %v1143_v15 = vrot.slane %v1142_v27, 1  ;;  %v921_v49 = vand.u32 3, %v920_v28 }
 0x181   : > { %v1173_v34 = vrot.slane %v1172_v30, 1  ;;  %v1158_v48 = vadd.f32 %v1157_v25, %v1156_v24  ;;  %vm508_vm3 = vcmp.lt.s32.totalorder %v507_v10, 2  ;;  %vm506_vm4 = vweird.f32 %v1928_v17 }
 0x182   : > { %vm1443_vm0 = vcmp.lt.s32.totalorder %v1442_v21, 0  ;;  %v1188_v35 = vadd.f32 %v1187_v45, %v1186_v18  ;;  %v1144_v52 = vadd.f32 %v1143_v15, %v1142_v27  ;;  %vm923_vm5 = vcmp.eq.s32.totalorder %v921_v49, 0 }
 0x183   : > { %v691_v12 = vsel %vm1443_vm0, 0, %v1442_v21  ;;  %v1174_v53 = vadd.f32 %v1173_v34, %v1172_v30  ;;  %vm926_vm6 = vcmp.eq.s32.totalorder %v921_v49, 2  ;;  %v1159_v39 = vrot.slane %v1158_v48, 1 }
 0x184   : > { %v692_v33 = vsub.s32 32, %v691_v12  ;;  %v696_v2 = vsub.s32 4294967266, %v691_v12  ;;  %v693_v40 = vshll.u32 %v684_v26, %v691_v12  ;;  %v1189_v59 = vrot.slane %v1188_v35, 1 }
 0x185   : > { %v1460_v50 = vadd.f32 -3.0, %v1144_v52  ;;  %vm922_vm7 = vcmp.lt.s32.totalorder %v921_v49, 2  ;;  %v1462_v0 = vadd.f32 -1.0, %v1174_v53  ;;  %v1160_v22 = vadd.f32 %v1159_v39, %v1158_v48 }
 0x186   : > { %v694_v44 = vshrl.u32 %v676_v63, %v692_v33  ;;  %v697_v46 = vadd.s32 127, %v696_v2  ;;  %v1190_v26 = vadd.f32 %v1189_v59, %v1188_v35  ;;  %vm2243_vm8 = vcmp.le.f32.partialorder %v620_v62, 0.7853982 }
 0x187   : > { %v2237_v13 = vmul.f32 0.2, %v1460_v50  ;;  %vm622_vm9 = vcmp.lt.s32.totalorder %v2016_v9, 0  ;;  %v2248_v41 = vmul.f32 0.14285715, %v1462_v0  ;;  %v706_v38 = vsub.s32 4, %v2214_v57 }
 0x188   : > { %v1585_v7 = vpop.eup %1584  ;;  %v695_v42 = vor.u32 %v694_v44, %v693_v40  ;;  %v698_v51 = vshll.u32 %v697_v46, 23  ;;  %v2251_v19 = vmul.f32 0.2, %v1160_v22  ;;  %v2256_v1 = vmul.f32 0.14285715, %v1190_v26 }
 0x189   : > { %v1587_v29 = vpop.eup %1586  ;;  %v513_v31 = vxor.u32 2147483648, %v1585_v7  ;;  %v1199_v20 = vmul.f32 %v2237_v13, %v2237_v13  ;;  %v1219_v6 = vmul.f32 %v2248_v41, %v2248_v41  ;;  %v707_v10 = vsel %vm622_vm9, %v706_v38, %v2214_v57 }
 0x18a   : > { %v510_v56 = vxor.u32 2147483648, %v1587_v29  ;;  %v699_v36 = vor.u32 4788187, %v698_v51  ;;  %v702_v61 = vcvt.s32.f32 %v695_v42  ;;  %v1201_v21 = vmul.f32 %v2251_v19, %v2251_v19 }
 0x18b   : > { %v514_v47 = vsel %vm512_vm2, %v513_v31, %v1587_v29  ;;  %v928_v58 = vsel %vm926_vm6, %v513_v31, %v1587_v29  ;;  %v1221_v24 = vmul.f32 %v2256_v1, %v2256_v1  ;;  %v709_v27 = vsel %vm2243_vm8, 0, %v707_v10 }
 0x18c   : > { %v511_v43 = vsel %vm509_vm1, %v1585_v7, %v510_v56  ;;  %v925_v37 = vsel %vm923_vm5, %v1585_v7, %v510_v56  ;;  %v700_v60 = vand.u32 2147483647, %v699_v36  ;;  %v2267_v7 = vadd.f32 %v1201_v21, %v1199_v20 }
 0x18d   : > { %v515_v3 = vsel %vm508_vm3, %v511_v43, %v514_v47  ;;  %v929_v55 = vsel %vm922_vm7, %v925_v37, %v928_v58  ;;  %v2271_v28 = vadd.f32 %v1221_v24, %v1219_v6  ;;  %v1128_v30 = vadd.s32 3, %v709_v27 }
 0x18e   : > { %v516_v54 = vsel %vm506_vm4, nan, %v515_v3  ;;  %v703_v5 = vmul.f32 %v702_v61, %v700_v60  ;;  %v930_v8 = vsel %vm506_vm4, nan, %v929_v55  ;;  %v713_v56 = vand.u32 3, %v709_v27 }
 0x18f   : > { %v1145_v4 = vrot.slane %v516_v54, 4  ;;  %v1161_v62 = vrot.slane %v930_v8, 4  ;;  %v1129_v31 = vand.u32 3, %v1128_v30  ;;  %vm712_vm0 = vweird.f32 %v2016_v9 }
 0x190   : > { %v704_v23 = vxor.u32 2147483648, %v703_v5  ;;  %vm718_vm10 = vcmp.eq.s32.totalorder %v713_v56, 2  ;;  %vm715_vm12 = vcmp.eq.s32.totalorder %v713_v56, 0  ;;  %vm714_vm14 = vcmp.lt.s32.totalorder %v713_v56, 2 }
 0x191   : > { %v1146_v16 = vadd.f32 %v1145_v4, %v516_v54  ;;  %v1162_v18 = vadd.f32 %v1161_v62, %v930_v8  ;;  %vm1134_vm11 = vcmp.eq.s32.totalorder %v1129_v31, 2  ;;  %vm1131_vm13 = vcmp.eq.s32.totalorder %v1129_v31, 0 }
 0x192   : > { %v705_v32 = vsel %vm622_vm9, %v704_v23, %v703_v5  ;;  %vm1130_vm15 = vcmp.lt.s32.totalorder %v1129_v31, 2  ;;  %vm1207_vm1 = vcmp.eq.f32.partialorder %v2267_v7, inf  ;;  %vm1227_vm2 = vcmp.eq.f32.partialorder %v2271_v28, inf }
 0x193   : > { %v708_v17 = vsel %vm2243_vm8, %v2016_v9, %v705_v32  ;;  %v1147_v11 = vrot.slane %v1146_v16, 2  ;;  %v1163_v29 = vrot.slane %v1162_v18, 2  ;;  %v1210_v14 = vand.u32 2147483648, %v2267_v7 }
 0x194   : > { %1588 = vcosq.f32 %v708_v17  ;;  %vm1209_vm3 = vcmp.eq.f32.partialorder %v2267_v7, 0.0  ;;  %vm1229_vm4 = vcmp.eq.f32.partialorder %v2271_v28, 0.0  ;;  %v1245_v21 = vmul.f32 %v2248_v41, %v2237_v13 }
 0x195   : > { %1590 = vsinq.f32 %v708_v17  ;;  %v1148_v12 = vadd.f32 %v1147_v11, %v1146_v16  ;;  %v1164_v25 = vadd.f32 %v1163_v29, %v1162_v18  ;;  %v1230_v16 = vand.u32 2147483648, %v2271_v28 }
 0x196   : > { %1592 = vrsqrt.f32 %v2267_v7  ;;  %v1262_v41 = vstv %s2298_s23 }
 0x197   : > { %1594 = vrsqrt.f32 %v2271_v28  ;;  %v1149_v57 = vrot.slane %v1148_v12, 1  ;;  %v1165_v15 = vrot.slane %v1164_v25, 1 }
 0x199   : > { %v1150_v45 = vadd.f32 %v1149_v57, %v1148_v12  ;;  %v1166_v46 = vadd.f32 %v1165_v15, %v1164_v25 }
 0x19b   : > { %v1461_v34 = vadd.f32 -3.0, %v1150_v45  ;;  %v2278_v54 = vmul.f32 0.2, %v1166_v46 }
 0x19d   : > { %v2276_v52 = vmul.f32 0.2, %v1461_v34  ;;  %v1202_v0 = vmul.f32 %v2278_v54, %v2278_v54 }
 0x19f   : > { %v1200_v9 = vmul.f32 %v2276_v52, %v2276_v52 }
 0x1a1   : > { %v1589_v33 = vpop.eup %1588  ;;  %v1204_v26 = vadd.f32 %v1202_v0, %v1200_v9  ;;  %v1285_v9 = vstv %s1465_s28 }
 0x1a2   : > { %v719_v63 = vxor.u32 2147483648, %v1589_v33  ;;  %v1591_v2 = vpop.eup %1590 }
 0x1a3   : > { %v716_v43 = vxor.u32 2147483648, %v1591_v2  ;;  %v1593_v51 = vpop.eup %1592  ;;  %1596 = vrsqrt.f32 %v1204_v26  ;;  %vm1214_vm5 = vcmp.eq.f32.partialorder %v1204_v26, inf  ;;  %v1217_v45 = vand.u32 2147483648, %v1204_v26 }
 0x1a4   : > { %v720_v47 = vsel %vm718_vm10, %v719_v63, %v1591_v2  ;;  %v1136_v49 = vsel %vm1134_vm11, %v719_v63, %v1591_v2  ;;  %v1595_v39 = vpop.eup %1594  ;;  %v1206_v59 = vmul.f32 %v1593_v51, %v2267_v7  ;;  %vm1216_vm6 = vcmp.eq.f32.partialorder %v1204_v26, 0.0 }
 0x1a5   : > { %v717_v40 = vsel %vm715_vm12, %v1589_v33, %v716_v43  ;;  %v1133_v44 = vsel %vm1131_vm13, %v1589_v33, %v716_v43  ;;  %v1226_v60 = vmul.f32 %v1595_v39, %v2271_v28 }
 0x1a6   : > { %v721_v48 = vsel %vm714_vm14, %v717_v40, %v720_v47  ;;  %v1137_v35 = vsel %vm1130_vm15, %v1133_v44, %v1136_v49  ;;  %v1208_v5 = vsel %vm1207_vm1, %v2267_v7, %v1206_v59  ;;  %v1249_v7 = vmul.f32 %v2256_v1, %v2251_v19 }
 0x1a7   : > { %v722_v3 = vsel %vm712_vm0, nan, %v721_v48  ;;  %v1138_v42 = vsel %vm712_vm0, nan, %v1137_v35  ;;  %v1228_v22 = vsel %vm1227_vm2, %v2271_v28, %v1226_v60  ;;  %v1211_v17 = vsel %vm1209_vm3, %v1210_v14, %v1208_v5 }
 0x1a8   : > { %v1175_v53 = vrot.slane %v722_v3, 4  ;;  %v1191_v36 = vrot.slane %v1138_v42, 4  ;;  %v1231_v62 = vsel %vm1229_vm4, %v1230_v16, %v1228_v22  ;;  %v1259_v19 = vstv %s2300_s26 }
 0x1a9   : > { %v1243_v11 = vmul.f32 %v1231_v62, %v1211_v17  ;;  %v1239_v57 = vsub.f32 %v1231_v62, %v1211_v17  ;;  %vm1292_vm15 = vcmask 1040384  }
 0x1aa   : > { %v1176_v37 = vadd.f32 %v1175_v53, %v722_v3  ;;  %v1192_v58 = vadd.f32 %v1191_v36, %v1138_v42 }
 0x1ab   : > { %v1247_v27 = vsub.f32 %v1243_v11, %v1245_v21  ;;  %v1241_v56 = vmul.f32 %v1239_v57, %v1239_v57 }
 0x1ac   : > { %v1177_v61 = vrot.slane %v1176_v37, 2  ;;  %v1193_v50 = vrot.slane %v1192_v58, 2 }
 0x1ad   : > { %v1251_v28 = vsub.f32 %v1247_v27, %v1249_v7  ;;  %v1260_v47 = vmul.f32 %v1259_v19, %v1241_v56 }
 0x1ae   : > { %v1178_v55 = vadd.f32 %v1177_v61, %v1176_v37  ;;  %v1194_v4 = vadd.f32 %v1193_v50, %v1192_v58  ;;  %v1281_v58 = vlaneseq }
 0x1af   : > { %v1253_v30 = vmul.f32 2.0, %v1251_v28 }
 0x1b0   : > { %v1179_v23 = vrot.slane %v1178_v55, 1  ;;  %v1195_v8 = vrot.slane %v1194_v4, 1  ;;  %v1597_v29 = vpop.eup %1596  ;;  %v1282_v60 = vand.u32 127, %v1281_v58 }
 0x1b1   : > { %v1213_v25 = vmul.f32 %v1597_v29, %v1204_v26  ;;  %v1255_v13 = vmax.f32 %v1253_v30, 1e-12 }
 0x1b2   : > { %v1180_v32 = vadd.f32 %v1179_v23, %v1178_v55  ;;  %v1196_v38 = vadd.f32 %v1195_v8, %v1194_v4  ;;  %v1283_v61 = vadd.s32 128, %v1282_v60  ;;  %v1286_v50 = vadd.s32 %v1285_v9, %v1282_v60 }
 0x1b3   : > { %v1215_v31 = vsel %vm1214_vm5, %v1204_v26, %v1213_v25  ;;  %v1263_v63 = vmul.f32 %v1262_v41, %v1255_v13 }
 0x1b4   : > { %v1463_v20 = vadd.f32 -1.0, %v1180_v32  ;;  %v1198_v6 = vmul.f32 0.14285715, %v1196_v38  ;;  %v1218_v2 = vsel %vm1216_vm6, %v1217_v45, %v1215_v31  ;;  %v1287_v55 = vadd.s32 %v1285_v9, %v1283_v61 }
 0x1b5   : > { %v1265_v44 = vadd.f32 %v1263_v63, %v1260_v47  ;;  %vm1288_vm11 = vcmp.lt.s32.totalorder %v1286_v50, 384 }
 0x1b6   : > { %v1184_v10 = vmul.f32 0.14285715, %v1463_v20  ;;  %v1222_v18 = vmul.f32 %v1198_v6, %v1198_v6  ;;  %v1250_v35 = vmul.f32 %v1198_v6, %v2278_v54  ;;  %vm1289_vm13 = vcmp.lt.s32.totalorder %v1287_v55, 384 }
 0x1b7   : > { %vm1269_vm9 = vcmp.eq.f32.partialorder %v1265_v44, inf  ;;  %v1272_v54 = vand.u32 2147483648, %v1265_v44  ;;  %vm1271_vm10 = vcmp.eq.f32.partialorder %v1265_v44, 0.0 }
 0x1b8   : > { %v1220_v24 = vmul.f32 %v1184_v10, %v1184_v10  ;;  %v1246_v40 = vmul.f32 %v1184_v10, %v2276_v52 }
 0x1ba   : > { %v1224_v12 = vadd.f32 %v1222_v18, %v1220_v24 }
 0x1bc   : > { %1598 = vrsqrt.f32 %v1224_v12  ;;  %vm1234_vm7 = vcmp.eq.f32.partialorder %v1224_v12, inf  ;;  %v1237_v15 = vand.u32 2147483648, %v1224_v12  ;;  %vm1236_vm8 = vcmp.eq.f32.partialorder %v1224_v12, 0.0 }
 0x1bd   : > { %1600 = vrsqrt.f32 %v1265_v44 }
 0x1c9   : > { %v1599_v33 = vpop.eup %1598 }
 0x1ca   : > { %v1233_v1 = vmul.f32 %v1599_v33, %v1224_v12  ;;  %v1601_v59 = vpop.eup %1600 }
 0x1cb   : > { %v1268_v52 = vmul.f32 %v1601_v59, %v1265_v44 }
 0x1cc   : > { %v1235_v43 = vsel %vm1234_vm7, %v1224_v12, %v1233_v1 }
 0x1cd   : > { %v1238_v49 = vsel %vm1236_vm8, %v1237_v15, %v1235_v43  ;;  %v1270_v0 = vsel %vm1269_vm9, %v1265_v44, %v1268_v52 }
 0x1ce   : > { %v1244_v34 = vmul.f32 %v1238_v49, %v1218_v2  ;;  %v1240_v46 = vsub.f32 %v1238_v49, %v1218_v2  ;;  %v1273_v5 = vsel %vm1271_vm10, %v1272_v54, %v1270_v0 }
 0x1cf   : > { %v1290_v8 = vsel %vm1288_vm11, %v1273_v5, 0.0 }
 0x1d0   : > { %v1248_v48 = vsub.f32 %v1244_v34, %v1246_v40  ;;  %v1242_v42 = vmul.f32 %v1240_v46, %v1240_v46  ;;  %v1293_v32 = vsel %vm1292_vm15, %v1290_v8, 0.0 }
 0x1d2   : > { %v1252_v3 = vsub.f32 %v1248_v48, %v1250_v35  ;;  %v1261_v36 = vmul.f32 %v1259_v19, %v1242_v42 }
 0x1d4   : > { %v1254_v51 = vmul.f32 2.0, %v1252_v3 }
 0x1d6   : > { %v1256_v53 = vmax.f32 %v1254_v51, 1e-12 }
 0x1d8   : > { %v1264_v39 = vmul.f32 %v1262_v41, %v1256_v53 }
 0x1da   : > { %v1266_v37 = vadd.f32 %v1264_v39, %v1261_v36 }
 0x1dc   : > { %1602 = vrsqrt.f32 %v1266_v37  ;;  %vm1276_vm12 = vcmp.eq.f32.partialorder %v1266_v37, inf  ;;  %v1279_v26 = vand.u32 2147483648, %v1266_v37  ;;  %vm1278_vm14 = vcmp.eq.f32.partialorder %v1266_v37, 0.0 }
 0x1e9   : > { %v1603_v4 = vpop.eup %1602 }
 0x1ea   : > { %v1275_v22 = vmul.f32 %v1603_v4, %v1266_v37 }
 0x1ec   : > { %v1277_v23 = vsel %vm1276_vm12, %v1266_v37, %v1275_v22 }
 0x1ed   : > { %v1280_v14 = vsel %vm1278_vm14, %v1279_v26, %v1277_v23 }
 0x1ee   : > { %v1291_v16 = vsel %vm1289_vm13, %v1280_v14, 0.0 }
 0x1ef   : > { %v1294_v38 = vsel %vm1292_vm15, %v1291_v16, 0.0 }
 0x1f0   : > { %v1295_v17 = vadd.f32 %v1294_v38, %v1293_v32 }
 0x1f2   : > { %1296 = vadd.xlane.f32.xlu0 %v1295_v17 }
 0x27b   : > { %v1297_v62 = vpop.xlane.xlu0 %1296 }
 0x27c   : > { %v1298_v20 = vrot.slane %v1297_v62, 4 }
 0x27e   : > { %v1299_v6 = vadd.f32 %v1298_v20, %v1297_v62 }
 0x280   : > { %v1300_v11 = vrot.slane %v1299_v6, 2 }
 0x282   : > { %v1301_v10 = vadd.f32 %v1300_v11, %v1299_v6 }
 0x284   : > { %v1302_v21 = vrot.slane %v1301_v10, 1 }
 0x286   : > { %v1303_v24 = vadd.f32 %v1302_v21, %v1301_v10 }
 0x288   : > { %1495 = vpush %v1303_v24 }
 0x2b9   : > { %s1496_s7 = spop %1495 }
 0x2ba   : > { %v1305_v18 = vstv %s1496_s7 }
 0x2bb   : > { %1306 = vst [vmem:[%s215_s6] sm:$0xff] %v1305_v18 }
 0x2bc   : > { %1682 = shalt.err (!%p1679_p7)
}
 0x2bd   : > { %s1683_s10 = scalar_lea.hbm %s1319_s22, 128  ;;  %s1687_s23 = scalar_lea.hbm %s2352_s3, 256 }
 0x2be   : > { %p1684_p1 = scmp.ne.s32.totalorder %s1319_s22, %s1683_s10  ;;  %p1688_p11 = scmp.lt.s32.totalorder %s1319_s22, %s2352_s3 }
 0x2bf   : > { %p1689_p12 = scmp.lt.s32.totalorder %s1687_s23, %s1683_s10 }
 0x2c0   : > { %p1685_p5 = pnand %p1684_p1, %p2380_p9 }
 0x2c1   : > { %p1690_p13 = por %p1689_p12, %p1688_p11 }
 0x2c2   : > { %p1686_p8 = pneg %p1685_p5 }
 0x2c4   : > { %p1691_p3 = pnand %p1690_p13, %p1686_p8 }
 0x2c6   : > { %1694 = shalt.err (!%p1691_p3)
}
 0x2c7   : > { %1507 = dma.vmem_to_hbm [thread:$0]  (%p2380_p9), %s2309_s8, 128, %s1319_s22, %s1308_s29  }
 0x2c8 PF: > { %s1333_s4 = sand.u32 1, %s1729_s12   ;;  %p2381_p4 = scmp.ne.s32.totalorder %s2360_s25, 0 }
 0x2c9   : > { %p2382_p10 = scmp.ge.s32.totalorder %s1741_s15, 2  ;;  %s1334_s6 = scalar_lea.sflag [#allocation4], %s1333_s4 }
 0x2cb   : > { %p1521_p2 = pnand %p2382_p10, %p2381_p4 }
 0x2cd   : > { %p1522_p0 = pneg %p1521_p2 }
 0x2cf   : > { %1724 = dma.done.wait (%p1522_p0), %s1334_s6, 128  }
 0x2d0   : > { %1726 = vsyncadd (%p1522_p0), %s1334_s6, 4294967168  ;;  %p18_p6 = scmp.ge.s32.totalorder %s1804_s18, 4   ;;  %s2383_s12 = smov %s1733_s13 }
 0x2d1   : > { %s2384_s13 = smov %s1737_s14  ;;  %s2385_s14 = smov %s1816_s21 }
 0x2d2   : > { %s2386_s15 = smov %s1804_s18  ;;  %20 = sbr.rel (!%p18_p6) target bundleno = 7 (0x7), region = 86 }
 0x2d7   :  { %1339 = vsyncpa [#allocation3], 1 }
 0x2d8   :  { %1341 = vsyncpa [#allocation3 + $0x1], 1 }
 0x2d9   :  { %1342 = vsyncpa [#allocation8], 1 }
 0x2da   :  { %1343 = vsyncpa [#allocation4], 1 }
 0x2db   :  { %1345 = vsyncpa [#allocation4 + $0x1], 1 }
 0x2dc   :  { %1346 = vsyncpa [#allocation5], 1 }
 0x2dd   :  { %1348 = vsyncpa [#allocation5 + $0x1], 1 }

</bundles_post_ra>
